<compile_context>
chip_gen: v6e
topology: v6e:2x2x1
jax: 0.10.0
libtpu: 0.0.40
codegen_flags: <defaults>
</compile_context>

<pallas_src>
import jax
import jax.numpy as jnp
from jax.experimental import pallas as pl
from jax.experimental.pallas import tpu as pltpu


def _pad_within_kernel(x_ref, b_ref, o_ref):
    """x_ref: (BR, G*W) grouped input rows; b_ref: (G*W, G*K) block-diagonal
    one-hot; o_ref: (BR, G*K) zero-inserted output rows."""
    b = b_ref[...]
    x = x_ref[...].astype(b.dtype)          # no-op for float inputs
    y = jnp.dot(x, b, preferred_element_type=jnp.float32)
    o_ref[...] = y.astype(o_ref.dtype)


def _round_up(v, m):
    return ((v + m - 1) // m) * m


def pad_within(x, stride, *, vmem_budget_bytes=10 * 1024 * 1024):
    """x: (N, C, H, W) -> (N, C, H*stride, W*stride) with zeros inserted."""
    N, C, H, W = x.shape
    s = int(stride)
    K = s * s * W                # one input row -> s output rows, flattened
    R = N * C * H                # total input rows
    out_dtype = x.dtype

    compute_dtype = x.dtype if jnp.issubdtype(x.dtype, jnp.floating) else jnp.float32
    itemsize = jnp.dtype(out_dtype).itemsize
    c_itemsize = jnp.dtype(compute_dtype).itemsize

    lane = 128
    # Group G consecutive input rows into one output row so the output last
    # dim is a multiple of 128 (full-lane, unmasked stores).  G must divide R
    # so the grouping / ungrouping reshapes stay contiguous (free).
    G = 1
    if K % lane != 0:
        best = None
        for g in range(2, 65):
            if R % g == 0 and (g * K) % lane == 0:
                best = g
                break
        if best is None:
            for g in range(2, 65):
                if R % g == 0 and g * K >= lane:
                    best = g
                    break
        if best is not None:
            G = best

    Rg = R // G                  # grouped row count
    Wg = G * W                   # grouped input row width
    Kg = G * K                   # grouped output row width

    # Block-diagonal one-hot zero-insertion matrix:
    #   bmat[g*W + w, g*K + w*s] = 1, everything else 0.
    rows = jnp.arange(Wg)
    cols = jnp.arange(Kg)
    target = (rows // W) * K + (rows % W) * s
    bmat = (cols[None, :] == target[:, None]).astype(compute_dtype)

    # Rows per block: fill ~vmem_budget_bytes with double-buffered in/out
    # blocks (accounting for lane padding), the f32 matmul result, and the
    # resident bmat.
    bmat_bytes = _round_up(Wg, 8) * _round_up(Kg, lane) * c_itemsize
    in_row_b = _round_up(Wg, lane) * itemsize
    out_row_b = _round_up(Kg, lane) * itemsize
    acc_row_b = _round_up(Kg, lane) * 4
    per_row_b = 2 * (in_row_b + out_row_b) + acc_row_b
    budget = max(per_row_b * 8, vmem_budget_bytes - 2 * bmat_bytes)
    br = max(8, budget // per_row_b // 8 * 8)
    if Rg // 2 >= 8:
        br = min(br, Rg // 2 // 8 * 8)       # keep >= 2 grid steps (v7x: 2 TCs)
    br = min(br, Rg)

    xg = x.reshape(Rg, Wg)                   # contiguous reshape, free

    out = pl.pallas_call(
        _pad_within_kernel,
        out_shape=jax.ShapeDtypeStruct((Rg, Kg), out_dtype),
        grid=(pl.cdiv(Rg, br),),
        in_specs=[
            pl.BlockSpec((br, Wg), lambda i: (i, 0)),
            pl.BlockSpec((Wg, Kg), lambda i: (0, 0)),   # constant -> VMEM-resident
        ],
        out_specs=pl.BlockSpec((br, Kg), lambda i: (i, 0)),
        compiler_params=pltpu.CompilerParams(dimension_semantics=("parallel",)),
    )(xg, bmat)

    # (Rg, G*K) -> (N, C, H*s, W*s): pure contiguous reshape (free).
    return out.reshape(N, C, H * s, W * s)


if __name__ == "__main__":
    stride = 2
    N, C, H, W = 2, 4, 16, 16

    # The module's only "parameter" is the buffer w = zeros(s, s); w[0, 0] = 1,
    # fully determined by `stride`; documented here for completeness.
    w = jnp.zeros((stride, stride), jnp.float32).at[0, 0].set(1.0)
    assert float(w[0, 0]) == 1.0

    key = jax.random.PRNGKey(0)
    x = jax.random.normal(key, (N, C, H, W), dtype=jnp.float32)

    out = jax.block_until_ready(pad_within(x, stride))

    # Reference: conv_transpose2d with the one-hot depthwise kernel == strided scatter.
    ref = jnp.zeros((N, C, H * stride, W * stride), x.dtype)
    ref = ref.at[:, :, ::stride, ::stride].set(x)

    assert out.shape == (N, C, H * stride, W * stride)
    assert jnp.allclose(out, ref), "mismatch vs reference"
    print("KERNEL_OK")
</pallas_src>

<mosaic_0001>
module attributes {stable_mosaic.version = 11 : i64} {
  func.func @_pad_within_kernel(%arg0: i32, %arg1: memref<32x32xf32, #tpu.memory_space<vmem>>, %arg2: memref<32x128xf32, #tpu.memory_space<vmem>>, %arg3: memref<32x128xf32, #tpu.memory_space<vmem>>) attributes {dimension_semantics = [#tpu.dimension_semantics<parallel>], iteration_bounds = array<i64: 2>, scalar_prefetch = 0 : i64, scratch_operands = 0 : i64, tpu.core_type = #tpu.core_type<tc>, window_params = [{transform_indices = @transform_0, window_bounds = array<i64: 32, 32>}, {pipeline_mode = #tpu.pipeline_mode<synchronous>, transform_indices = @transform_1, window_bounds = array<i64: 32, 128>}, {transform_indices = @transform_2, window_bounds = array<i64: 32, 128>}]} {
    %c0 = arith.constant 0 : index
    %c0_0 = arith.constant 0 : index
    %0 = vector.load %arg2[%c0, %c0_0] : memref<32x128xf32, #tpu.memory_space<vmem>>, vector<32x128xf32>
    %c0_1 = arith.constant 0 : index
    %c0_2 = arith.constant 0 : index
    %1 = vector.load %arg1[%c0_1, %c0_2] : memref<32x32xf32, #tpu.memory_space<vmem>>, vector<32x32xf32>
    %cst = arith.constant dense<0.000000e+00> : vector<32x128xf32>
    %2 = tpu.matmul %1, %0, %cst {dimension_numbers = #tpu.dot_dimension_numbers<[1], [0], [0], [1], [0, 0, 1, 1], [], []>} : vector<32x32xf32>, vector<32x128xf32>, vector<32x128xf32> -> vector<32x128xf32>
    %c0_3 = arith.constant 0 : index
    %c0_4 = arith.constant 0 : index
    %3 = vector.load %arg3[%c0_3, %c0_4] : memref<32x128xf32, #tpu.memory_space<vmem>>, vector<32x128xf32>
    tpu.vector_store %arg3[%c0_3, %c0_4], %2 {strides = array<i32>} : memref<32x128xf32, #tpu.memory_space<vmem>>, vector<32x128xf32>,
    return
  }
  func.func @transform_0(%arg0: i32) -> (i32, i32) {
    %c0_i32 = arith.constant 0 : i32
    %c0_i32_0 = arith.constant 0 : i32
    return %arg0, %c0_i32 : i32, i32
  }
  func.func @transform_1(%arg0: i32) -> (i32, i32) {
    %c0_i32 = arith.constant 0 : i32
    %c0_i32_0 = arith.constant 0 : i32
    %c0_i32_1 = arith.constant 0 : i32
    return %c0_i32, %c0_i32_0 : i32, i32
  }
  func.func @transform_2(%arg0: i32) -> (i32, i32) {
    %c0_i32 = arith.constant 0 : i32
    %c0_i32_0 = arith.constant 0 : i32
    return %arg0, %c0_i32 : i32, i32
  }
}

</mosaic_0001>

<bundles_post_ra>
// kernel: tpu_custom_call.1
= control target key start
LH: loop header
LB: loop body
LE: loop exit
PB: predicated region body
PF: predicated region fallthrough
CT: control target
= control target key end

     0   :  { %7 = vsyncpa [#allocation3], 0  ;;  %s612_s0 = inlined_call_operand.vmem [shape: f32[64,32], index: 0, kind: input, shape index: {}]   ;;  %s613_s1 = inlined_call_operand.vmem [shape: f32[32,128], index: 1, kind: input, shape index: {}]   ;;  %s614_s2 = inlined_call_operand.hbm [shape: f32[64,128], index: 2, kind: output, shape index: {}]  }
   0x1   :  { %9 = vsyncpa [#allocation3 + $0x1], 0  ;;  %s499_s9 = smov 0   ;;  %s501_s10 = smov 0  }
   0x2   :  { %s503_s11 = smov 0   ;;  %s505_s12 = smov 0  }
   0x3 LB: > { %s520_s13 = sadd.s32 4294967295, %s479_s12   ;;  %s331_s14 = sadd.s32 4294967294, %s479_s12   ;;  %s479_s12 = sphi %s505_s12, %s620_s12   ;;  %s475_s11 = sphi %s503_s11, %s619_s11   ;;  %s471_s10 = sphi %s501_s10, %s618_s10   ;;  %s467_s9 = sphi %s499_s9, %s617_s9  }
   0x4   : > { %s524_s15 = sadd.s32 1, %s479_s12   ;;  %s69_s16 = sadd.s32 1, %s475_s11 }
   0x5   : > { %s66_s17 = ssub.s32 %s479_s12, %s524_s15  ;;  %p79_p0 = scmp.ne.s32.totalorder %s475_s11, %s471_s10 }
   0x6   : > { %p67_p1 = scmp.eq.s32.totalorder %s66_s17, 0  ;;  %p80_p2 = scmp.eq.s32.totalorder %s520_s13, 1 }
   0x7   : > { %p85_p3 = scmp.ne.s32.totalorder %s471_s10, %s467_s9  ;;  %p86_p4 = scmp.eq.s32.totalorder %s331_s14, 1 }
   0x8   : > { %s535_s18 = scalar_select %p67_p1, %s475_s11, %s69_s16  }
   0x9   : > { %p537_p5 = por %p80_p2, %p79_p0  ;;  %p541_p6 = por %p86_p4, %p85_p3 }
   0xa   : > { %p334_p7 = scmp.ge.s32.totalorder %s479_s12, 1  ;;  %p116_p8 = scmp.lt.s32.totalorder %s479_s12, 3 }
   0xc   : > { %p117_p9 = pnand %p334_p7, %p116_p8 }
   0xd   : > { %s336_s25 = sshll.u32 (!%p117_p9), %s520_s13, 2  ;;  %s135_s6 = sand.u32 (!%p117_p9), 1, %s471_s10  }
   0xe   : > { %120 = sbr.rel (%p117_p9) target bundleno = 238 (0xee), region = 28  ;;  %p139_p10 = scmp.lt.s32.totalorder (!%p117_p9), %s336_s25, 7 }
   0xf   : > { %s335_s7 = sshll.u32 (!%p117_p9), %s135_s6, 5  ;;  %s347_s16 = sshll.u32 (!%p117_p9), %s520_s13, 9 }
  0x10   : > { %s137_s8 = scalar_lea.vmem (!%p117_p9), [#allocation2], %s335_s7  ;;  %s570_s22 = scalar_lea.hbm (!%p117_p9), %s614_s2, %s347_s16 }
  0x11   : > { %s269_s14 = sshll.u32 (!%p117_p9), %s137_s8, 4  ;;  %s572_s23 = scalar_lea.sflag (!%p117_p9), [#allocation3], %s135_s6  ;;  %s565_s14 = int_to_ptr.vmem [resolvable:$true] %s269_s14 }
  0x12   : > { %s419_s13 = scalar_lea.vmem (!%p117_p9), %s565_s14, 512  ;;  %s481_s24 = smov (!%p117_p9), [#allocation2]  }
  0x13   : > { %v148_v0 = vld [vmem:[%s613_s1 + $0x18] sm:$0xff]  ;;  %v147_v1 = vld [vmem:[%s613_s1 + $0x10] sm:$0xff]  ;;  %v146_v2 = vld [vmem:[%s613_s1 + $0x8] sm:$0xff]  ;;  %s622_s25 = smov (!%p139_p10, %s336_s25), 7  ;;  %vm153_vm0 = vcmask 261120   ;;  %p420_p11 = scmp.ne.s32.totalorder %s565_s14, %s419_s13 }
  0x14   : > { %356 = vmatprep.subr.mxu0 %v148_v0  ;;  %370 = vmatprep.subr.mxu1 %v148_v0  ;;  %v145_v3 = vld [vmem:[%s613_s1] sm:$0xff]  ;;  %s337_s30 = sshll.u32 %s622_s25, 3  ;;  %s423_s25 = sshll.u32 %s481_s24, 4  ;;  %s424_s25 = int_to_ptr.vmem [resolvable:$false] %s423_s25 }
  0x15   : > { %357 = vmatpush3.msra.mxu0 %v148_v0  ;;  %374 = vmatpush3.msra.mxu1 %v148_v0  ;;  %s142_s5 = scalar_lea.vmem %s612_s0, %s337_s30  ;;  %p421_p12 = pnand %p420_p11, %p537_p5 }
  0x16   : > { %358 = vmatprep.subr.mxu0 %v147_v1  ;;  %371 = vmatprep.subr.mxu1 %v147_v1  ;;  %v149_v4 = vld [vmem:[%s142_s5] sm:$0xff]  ;;  %v151_v5 = vld [vmem:[%s142_s5 + $0x10] sm:$0xff]  ;;  %v150_v6 = vld [vmem:[%s142_s5 + $0x8] sm:$0xff]  ;;  %s425_s26 = scalar_lea.vmem %s424_s25, 1024  ;;  %p426_p0 = scmp.lt.s32.totalorder %s565_s14, %s424_s25 }
  0x17   : > { %359 = vmatpush3.msra.mxu0 %v147_v1  ;;  %375 = vmatpush3.msra.mxu1 %v147_v1  ;;  %v152_v7 = vld [vmem:[%s142_s5 + $0x18] sm:$0xff]  ;;  %p422_p13 = pneg %p421_p12  ;;  %p427_p1 = scmp.lt.s32.totalorder %s425_s26, %s419_s13 }
  0x18   : > { %360 = vmatprep.subr.mxu0 %v146_v2  ;;  %372 = vmatprep.subr.mxu1 %v146_v2 }
  0x19   : > { %361 = vmatpush3.msra.mxu0 %v146_v2  ;;  %376 = vmatpush3.msra.mxu1 %v146_v2  ;;  %p428_p2 = por %p427_p1, %p426_p0 }
  0x1a   : > { %362 = vmatprep.subr.mxu0 %v145_v3  ;;  %373 = vmatprep.subr.mxu1 %v145_v3 }
  0x1b   : > { %363 = vmatpush3.msra.mxu0 %v145_v3  ;;  %377 = vmatpush3.msra.mxu1 %v145_v3  ;;  %p429_p3 = pnand %p428_p2, %p422_p13 }
  0x1c   : > { %364 = vmatprep.mubr.msk.f32.mxu0 %vm153_vm0, %v149_v4  ;;  %367 = vmatprep.mubr.msk.f32.mxu1 %vm153_vm0, %v151_v5 }
  0x1d   : > { %365 = vmatmul.mubr.msk.f32.vlgmr.msra.gmra.mxu0 %vm153_vm0, %v150_v6  ;;  %368 = vmatmul.mubr.msk.f32.vlgmr.msra.gmra.mxu1 %vm153_vm0, %v152_v7 }
  0xdd   : > { %v366_v8 = vpop.f32.mrf.mxu0  ;;  %v369_v9 = vpop.f32.mrf.mxu1 }
  0xde   : > { %252 = vst [vmem:[%s137_s8 + $0x8] sm:$0xff] %v366_v8  ;;  %254 = vst [vmem:[%s137_s8 + $0x18] sm:$0xff] %v369_v9 }
  0xdf   : > { %v232_v10 = vpop.f32.mrf.mxu0  ;;  %v242_v11 = vpop.f32.mrf.mxu1 }
  0xe0   : > { %251 = vst [vmem:[%s137_s8] sm:$0xff] %v232_v10  ;;  %253 = vst [vmem:[%s137_s8 + $0x10] sm:$0xff] %v242_v11 }
  0xe1   : > { %432 = shalt.err (!%p429_p3)
}
  0xe2   : > { %s433_s27 = scalar_lea.hbm %s570_s22, 512  ;;  %s437_s30 = scalar_lea.hbm %s614_s2, 1024 }
  0xe3   : > { %p434_p4 = scmp.ne.s32.totalorder %s570_s22, %s433_s27  ;;  %p438_p9 = scmp.lt.s32.totalorder %s570_s22, %s614_s2 }
  0xe4   : > { %p439_p10 = scmp.lt.s32.totalorder %s437_s30, %s433_s27 }
  0xe5   : > { %p435_p7 = pnand %p434_p4, %p537_p5 }
  0xe6   : > { %p440_p11 = por %p439_p10, %p438_p9 }
  0xe7   : > { %p436_p8 = pneg %p435_p7 }
  0xe9   : > { %p441_p12 = pnand %p440_p11, %p436_p8 }
  0xeb   : > { %444 = shalt.err (!%p441_p12)
}
  0xec   : > { %s482_s5 = smov 128   ;;  %s483_s6 = smov 8  }
  0xed   : > { %378 = dma.vmem_to_hbm [thread:$0]  (%p537_p5), %s565_s14, 512, %s570_s22, %s572_s23, %s482_s5, %s482_s5, %s483_s6  }
  0xee PF: > { %p384_p13 = scmp.ge.s32.totalorder %s479_s12, 2  ;;  %s284_s7 = sand.u32 1, %s467_s9  }
  0xef   : > { %s285_s8 = scalar_lea.sflag [#allocation3], %s284_s7 }
  0xf0   : > { %p381_p0 = pnand %p384_p13, %p541_p6 }
  0xf2   : > { %p382_p1 = pneg %p381_p0 }
  0xf4   : > { %462 = dma.done.wait (%p382_p1), %s285_s8, 512  }
  0xf5   : > { %464 = vsyncadd (%p382_p1), %s285_s8, 4294966784  ;;  %p12_p2 = scmp.ge.s32.totalorder %s524_s15, 4   ;;  %s617_s9 = smov %s471_s10 }
  0xf6   : > { %s618_s10 = smov %s475_s11  ;;  %s619_s11 = smov %s535_s18 }
  0xf7   : > { %s620_s12 = smov %s524_s15  ;;  %14 = sbr.rel (!%p12_p2) target bundleno = 3 (0x3), region = 63 }
  0xfc   :  { %290 = vsyncpa [#allocation3], 1 }
  0xfd   :  { %292 = vsyncpa [#allocation3 + $0x1], 1 }

</bundles_post_ra>
